<compile_context>
chip_gen: v7x
topology: tpu7x:2x2x1
jax: 0.10.0
libtpu: 0.0.40
codegen_flags: <defaults>
</compile_context>

<pallas_src>
import functools

import jax
import jax.numpy as jnp
from jax.experimental import pallas as pl
from jax.experimental.pallas import tpu as pltpu

EPS = 1e-5
HID = 16
LANES = 128          # lane-dense slab / output width


def _mm(a, b):
    # MXU matmul: bf16 operands, f32 accumulation.
    return jnp.dot(a.astype(jnp.bfloat16), b, preferred_element_type=jnp.float32)


def _std(v):
    # Training-mode BatchNorm standardization over the batch axis (biased variance);
    # gamma/beta are folded into the following Linear by pack_params where possible.
    mu = jnp.mean(v, axis=0, keepdims=True)
    var = jnp.mean((v - mu) ** 2, axis=0, keepdims=True)
    return (v - mu) * jax.lax.rsqrt(var + EPS)


def _make_kernel(f_in, offs, out_x, out_y):
    o_c1, o_c2, o_l1, o_l2, o_l3, o_h = offs
    out_t = out_x + out_y + 4

    def kernel(x_ref, a_ref, p_ref, w_ref, b_ref, o_ref):
        x = x_ref[...]            # [N, F]    bf16 node features (one graph batch)
        A = a_ref[...]            # [N, N]    bf16 mean-neighbor aggregation matrix
        P = p_ref[...]            # [B, N]    bf16 per-graph mean-pooling matrix
        bC = b_ref[...]           # [8, 128]  f32 biases / BN params

        def bias(i, n=HID):
            return bC[i:i + 1, :n]

        def w(off, rows, cols=HID):
            return w_ref[off:off + rows, :cols]

        # ---- SAGEConv 1 (split matmuls: mean-neighbors @ W_l + self @ W_r) + ReLU ----
        nbr = _mm(A, x)
        h = _mm(nbr, w(o_c1, f_in)) + _mm(x, w(o_c1 + f_in, f_in)) + bias(0)
        h = jnp.maximum(h, 0.0)

        # ---- BatchNorm over nodes (norm1; gamma/beta kept explicit) ----
        h = _std(h) * bias(6) + bias(7)

        # ---- SAGEConv 2 (split matmuls) + ReLU ----
        nbr2 = _mm(A, h)
        h2 = _mm(nbr2, w(o_c2, HID)) + _mm(h, w(o_c2 + HID, HID)) + bias(1)
        h2 = jnp.maximum(h2, 0.0)

        # ---- per-graph mean pooling ----
        xe = _mm(P, h2)                              # [B, HID]
        n_xe = _std(xe)                              # shared by norm_lin1/2/3 halves

        # ---- D2RL MLP head; BN gammas/betas already folded into W/b slabs ----
        x1 = jnp.maximum(_mm(n_xe, w(o_l1, HID)) + bias(2), 0.0)
        x2 = jnp.maximum(
            _mm(_std(x1), w(o_l2, HID)) + _mm(n_xe, w(o_l2 + HID, HID)) + bias(3), 0.0)
        x3 = jnp.maximum(
            _mm(_std(x2), w(o_l3, HID)) + _mm(n_xe, w(o_l3 + HID, HID)) + bias(4), 0.0)

        # ---- fused output heads: one matmul, one exp, masked segment softmaxes,
        #      one lane-dense [B, 128] store ----
        heads = _mm(x3, w(o_h, HID, LANES)) + bias(5, LANES)       # [B, 128] f32

        nb = heads.shape[0]
        lane = jax.lax.broadcasted_iota(jnp.int32, (nb, LANES), 1)
        in0 = lane < out_x
        in1 = jnp.logical_and(lane >= out_x, lane < out_x + out_y)
        in2 = jnp.logical_and(lane >= out_x + out_y, lane < out_t)
        valid = jnp.logical_or(in0, jnp.logical_or(in1, in2))

        neg = jnp.float32(-1e30)
        m0 = jnp.max(jnp.where(in0, heads, neg), axis=1, keepdims=True)
        m1 = jnp.max(jnp.where(in1, heads, neg), axis=1, keepdims=True)
        m2 = jnp.max(jnp.where(in2, heads, neg), axis=1, keepdims=True)
        m = jnp.where(in0, m0, jnp.where(in1, m1, m2))
        e = jnp.where(valid, jnp.exp(heads - m), 0.0)              # single EUP exp
        s0 = jnp.sum(jnp.where(in0, e, 0.0), axis=1, keepdims=True)
        s1 = jnp.sum(jnp.where(in1, e, 0.0), axis=1, keepdims=True)
        s2 = jnp.sum(jnp.where(in2, e, 0.0), axis=1, keepdims=True)
        denom = jnp.where(in0, s0, jnp.where(in1, s1, s2))
        o_ref[...] = e / denom

    return kernel


def pack_params(params, out_x, out_y):
    """Pack all 33 module parameters into one bf16 weight slab [R, 128] and one f32
    bias/BN slab [8, 128].  Call ONCE per parameter set (outside the hot path)."""
    def t(name):   # torch [out, in] -> [in, out]
        return jnp.asarray(params[name], jnp.float32).T

    def v(name):
        return jnp.asarray(params[name], jnp.float32)

    def padc(m):
        return jnp.pad(m, ((0, 0), (0, LANES - m.shape[1])))

    def padr(b):
        return jnp.pad(b, (0, LANES - b.shape[0]))

    out_t = out_x + out_y + 4

    # SAGEConv weights stacked [W_l ; W_r]; kernel reads the two halves separately.
    W_c1 = jnp.concatenate([t("conv1_lin_l_w"), t("conv1_lin_r_w")], axis=0)
    W_c2 = jnp.concatenate([t("conv2_lin_l_w"), t("conv2_lin_r_w")], axis=0)

    # BN gamma folded into W, BN beta folded into b:
    #   BN(v) @ W + b == std(v) @ (g[:,None]*W) + (beta @ W + b)
    W1 = t("lin_1_w")
    W1p = v("norm_lin1_w")[:, None] * W1
    b1p = v("norm_lin1_b") @ W1 + v("lin_1_b")

    W2 = t("lin_2_w")                     # rows 0:16 -> x1 half, 16:32 -> xe half
    W2p = v("norm_lin2_w")[:, None] * W2
    b2p = v("norm_lin2_b") @ W2 + v("lin_2_b")

    W3 = t("lin_3_w")
    W3p = v("norm_lin3_w")[:, None] * W3
    b3p = v("norm_lin3_b") @ W3 + v("lin_3_b")

    # Fused output heads (x | y | rot), zero-padded lane-dense to 128 columns.
    W_h = jnp.concatenate([t("linear_x_w"), t("linear_y_w"), t("linear_rot_w")], axis=1)
    b_h = jnp.concatenate([v("linear_x_b"), v("linear_y_b"), v("linear_rot_b")])

    blocks = [W_c1, W_c2, W1p, W2p, W3p, W_h]
    offs, r = [], 0
    for m in blocks:
        offs.append(r)
        r += m.shape[0]
    w_slab = jnp.concatenate([padc(m) for m in blocks], axis=0).astype(jnp.bfloat16)

    b_slab = jnp.stack([
        padr(v("conv1_lin_l_b")),        # 0
        padr(v("conv2_lin_l_b")),        # 1
        padr(b1p),                       # 2
        padr(b2p),                       # 3
        padr(b3p),                       # 4
        padr(b_h),                       # 5
        padr(v("norm1_w")),              # 6  norm1 gamma
        padr(v("norm1_b")),              # 7  norm1 beta
    ], axis=0)                            # [8, 128] f32

    return w_slab, b_slab, tuple(int(o) for o in offs), out_t


def build_graph_mats(edge_index, batch, num_nodes, num_graphs):
    """Dense mean-aggregation A [N,N] and mean-pooling P [B,N] as bf16 MXU operands.
    Build ONCE per graph topology (O(E)/O(N) scatters)."""
    src, dst = edge_index[0], edge_index[1]
    adj = jnp.zeros((num_nodes, num_nodes), jnp.float32).at[dst, src].add(1.0)
    deg = jnp.sum(adj, axis=1, keepdims=True)
    A = adj / jnp.maximum(deg, 1.0)       # clamp keeps isolated nodes at zero aggregation
    P = jnp.zeros((num_graphs, num_nodes), jnp.float32)
    P = P.at[batch, jnp.arange(num_nodes)].add(1.0)
    P = P / jnp.maximum(jnp.sum(P, axis=1, keepdims=True), 1.0)
    return A.astype(jnp.bfloat16), P.astype(jnp.bfloat16)


@functools.partial(jax.jit, static_argnames=("offs", "out_x", "out_y"))
def d2rl_actor_apply(x_seq, A_seq, P_seq, w_slab, b_slab, offs, out_x, out_y):
    """Batched forward over T independent graph batches (e.g. rollout timesteps).

    x_seq: [T, N, F] bf16, A_seq: [T, N, N] bf16, P_seq: [T, B, N] bf16,
    w_slab: [R, 128] bf16, b_slab: [8, 128] f32.
    Returns (xx [T,B,out_x], y [T,B,out_y], rot [T,B,4]) in f32.
    """
    T, N, f_in = x_seq.shape
    B = P_seq.shape[1]
    out_t = out_x + out_y + 4
    R, C = w_slab.shape

    kernel = _make_kernel(f_in, offs, out_x, out_y)

    out = pl.pallas_call(
        kernel,
        out_shape=jax.ShapeDtypeStruct((T, B, LANES), jnp.float32),
        grid_spec=pltpu.PrefetchScalarGridSpec(
            num_scalar_prefetch=0,
            grid=(T,),
            in_specs=[
                pl.BlockSpec((None, N, f_in), lambda t: (t, 0, 0)),
                pl.BlockSpec((None, N, N), lambda t: (t, 0, 0)),
                pl.BlockSpec((None, B, N), lambda t: (t, 0, 0)),
                pl.BlockSpec((R, C), lambda t: (0, 0)),            # params: DMA once
                pl.BlockSpec((8, LANES), lambda t: (0, 0)),        # biases: DMA once
            ],
            out_specs=pl.BlockSpec((None, B, LANES), lambda t: (t, 0, 0)),
        ),
        compiler_params=pltpu.CompilerParams(
            dimension_semantics=("parallel",)),
    )(x_seq, A_seq, P_seq, w_slab, b_slab)

    xx = out[:, :, :out_x]
    y = out[:, :, out_x:out_x + out_y]
    rot = out[:, :, out_x + out_y:out_t]
    return xx, y, rot


def d2rl_actor_forward(x, edge_index, batch, params, num_graphs):
    """Convenience wrapper matching the PyTorch module's single-batch forward."""
    out_x = params["linear_x_w"].shape[0]
    out_y = params["linear_y_w"].shape[0]
    w_slab, b_slab, offs, _ = pack_params(params, out_x, out_y)
    A, P = build_graph_mats(edge_index, batch, x.shape[0], num_graphs)
    xx, y, rot = d2rl_actor_apply(
        jnp.asarray(x, jnp.bfloat16)[None], A[None], P[None],
        w_slab, b_slab, offs, out_x, out_y)
    return xx[0], y[0], rot[0]


def init_params(key, in_dim, out_dim_x, out_dim_y):
    shapes = {
        "conv1_lin_l_w": (HID, in_dim), "conv1_lin_l_b": (HID,), "conv1_lin_r_w": (HID, in_dim),
        "norm1_w": (HID,), "norm1_b": (HID,),
        "conv2_lin_l_w": (HID, HID), "conv2_lin_l_b": (HID,), "conv2_lin_r_w": (HID, HID),
        "norm_lin1_w": (HID,), "norm_lin1_b": (HID,),
        "lin_1_w": (HID, HID), "lin_1_b": (HID,),
        "norm_lin2_w": (2 * HID,), "norm_lin2_b": (2 * HID,),
        "lin_2_w": (HID, 2 * HID), "lin_2_b": (HID,),
        "norm_lin3_w": (2 * HID,), "norm_lin3_b": (2 * HID,),
        "lin_3_w": (HID, 2 * HID), "lin_3_b": (HID,),
        "linear_x_w": (out_dim_x, HID), "linear_x_b": (out_dim_x,),
        "linear_y_w": (out_dim_y, HID), "linear_y_b": (out_dim_y,),
        "linear_rot_w": (4, HID), "linear_rot_b": (4,),
    }
    names = sorted(shapes)
    keys = jax.random.split(key, len(names))
    params = {}
    for k, name in zip(keys, names):
        noise = 0.1 * jax.random.normal(k, shapes[name], jnp.float32)
        if "norm" in name and name.endswith("_w"):
            params[name] = 1.0 + noise   # BN gamma ~ 1
        else:
            params[name] = noise
    return params


if __name__ == "__main__":
    N_PER_GRAPH = 8
    B = 2                      # graphs per batch
    N = N_PER_GRAPH * B        # total nodes per batch
    F_IN = 8                   # node feature dim (SAGEConv(-1, 16) is lazy on input dim)
    OUT_X, OUT_Y = 6, 5
    T = 4                      # rollout timesteps batched under one pallas_call

    key = jax.random.PRNGKey(0)
    kx, kp = jax.random.split(key)

    # deterministic bidirectional ring edges inside each graph
    nodes = jnp.arange(N_PER_GRAPH, dtype=jnp.int32)
    src = jnp.concatenate([nodes, (nodes + 1) % N_PER_GRAPH])
    dst = jnp.concatenate([(nodes + 1) % N_PER_GRAPH, nodes])
    src = jnp.concatenate([src, src + N_PER_GRAPH])
    dst = jnp.concatenate([dst, dst + N_PER_GRAPH])
    edge_index = jnp.stack([src, dst]).astype(jnp.int32)   # [2, 32]
    batch = jnp.repeat(jnp.arange(B, dtype=jnp.int32), N_PER_GRAPH)

    params = init_params(kp, F_IN, OUT_X, OUT_Y)

    # ---- one-time setup (hoisted out of the hot path) ----
    w_slab, b_slab, offs, out_t = pack_params(params, OUT_X, OUT_Y)
    A, P = build_graph_mats(edge_index, batch, N, B)
    A_seq = jnp.tile(A[None], (T, 1, 1))
    P_seq = jnp.tile(P[None], (T, 1, 1))

    # per-timestep node features (independent graph batches)
    x_seq = jax.random.normal(kx, (T, N, F_IN), jnp.float32).astype(jnp.bfloat16)

    # ---- batched hot-path call: one pallas_call, grid over T ----
    xx, y, rot = d2rl_actor_apply(x_seq, A_seq, P_seq, w_slab, b_slab, offs, OUT_X, OUT_Y)
    jax.block_until_ready((xx, y, rot))

    assert xx.shape == (T, B, OUT_X) and y.shape == (T, B, OUT_Y) and rot.shape == (T, B, 4)
    assert bool(jnp.all(jnp.isfinite(xx)) & jnp.all(jnp.isfinite(y)) & jnp.all(jnp.isfinite(rot)))
    assert bool(jnp.allclose(jnp.sum(xx, axis=-1), 1.0, atol=1e-4))
    assert bool(jnp.allclose(jnp.sum(y, axis=-1), 1.0, atol=1e-4))
    assert bool(jnp.allclose(jnp.sum(rot, axis=-1), 1.0, atol=1e-4))

    # single-forward wrapper (module-equivalent API) sanity check
    xx0, y0, rot0 = d2rl_actor_forward(x_seq[0].astype(jnp.float32), edge_index, batch, params, B)
    jax.block_until_ready((xx0, y0, rot0))
    assert xx0.shape == (B, OUT_X) and y0.shape == (B, OUT_Y) and rot0.shape == (B, 4)
    assert bool(jnp.allclose(xx0, xx[0], atol=1e-5))

    print("KERNEL_OK")
</pallas_src>

<mosaic_0001>
module attributes {stable_mosaic.version = 11 : i64} {
  func.func @kernel(%arg0: i32, %arg1: memref<1x16x8xbf16, #tpu.memory_space<vmem>>, %arg2: memref<1x16x16xbf16, #tpu.memory_space<vmem>>, %arg3: memref<1x2x16xbf16, #tpu.memory_space<vmem>>, %arg4: memref<144x128xbf16, #tpu.memory_space<vmem>>, %arg5: memref<8x128xf32, #tpu.memory_space<vmem>>, %arg6: memref<1x2x128xf32, #tpu.memory_space<vmem>>) attributes {dimension_semantics = [#tpu.dimension_semantics<parallel>], iteration_bounds = array<i64: 4>, scalar_prefetch = 0 : i64, scratch_operands = 0 : i64, tpu.core_type = #tpu.core_type<tc>, window_params = [{transform_indices = @transform_0, window_bounds = array<i64: 1, 16, 8>}, {transform_indices = @transform_1, window_bounds = array<i64: 1, 16, 16>}, {transform_indices = @transform_2, window_bounds = array<i64: 1, 2, 16>}, {pipeline_mode = #tpu.pipeline_mode<synchronous>, transform_indices = @transform_3, window_bounds = array<i64: 144, 128>}, {pipeline_mode = #tpu.pipeline_mode<synchronous>, transform_indices = @transform_4, window_bounds = array<i64: 8, 128>}, {transform_indices = @transform_5, window_bounds = array<i64: 1, 2, 128>}]} {
    %c0 = arith.constant 0 : index
    %c0_0 = arith.constant 0 : index
    %c0_1 = arith.constant 0 : index
    %0 = vector.load %arg1[%c0, %c0_0, %c0_1] : memref<1x16x8xbf16, #tpu.memory_space<vmem>>, vector<1x16x8xbf16>
    %1 = vector.shape_cast %0 : vector<1x16x8xbf16> to vector<16x8xbf16>
    %c0_2 = arith.constant 0 : index
    %c0_3 = arith.constant 0 : index
    %c0_4 = arith.constant 0 : index
    %2 = vector.load %arg2[%c0_2, %c0_3, %c0_4] : memref<1x16x16xbf16, #tpu.memory_space<vmem>>, vector<1x16x16xbf16>
    %3 = vector.shape_cast %2 : vector<1x16x16xbf16> to vector<16x16xbf16>
    %c0_5 = arith.constant 0 : index
    %c0_6 = arith.constant 0 : index
    %c0_7 = arith.constant 0 : index
    %4 = vector.load %arg3[%c0_5, %c0_6, %c0_7] : memref<1x2x16xbf16, #tpu.memory_space<vmem>>, vector<1x2x16xbf16>
    %5 = vector.shape_cast %4 : vector<1x2x16xbf16> to vector<2x16xbf16>
    %c0_8 = arith.constant 0 : index
    %c0_9 = arith.constant 0 : index
    %6 = vector.load %arg5[%c0_8, %c0_9] : memref<8x128xf32, #tpu.memory_space<vmem>>, vector<8x128xf32>
    %cst = arith.constant dense<0.000000e+00> : vector<16x8xf32>
    %7 = tpu.matmul %3, %1, %cst {dimension_numbers = #tpu.dot_dimension_numbers<[1], [0], [0], [1], [0, 0, 1, 1], [], []>} : vector<16x16xbf16>, vector<16x8xbf16>, vector<16x8xf32> -> vector<16x8xf32>
    %c0_10 = arith.constant 0 : index
    %c0_11 = arith.constant 0 : index
    %8 = vector.load %arg4[%c0_10, %c0_11] : memref<144x128xbf16, #tpu.memory_space<vmem>>, vector<8x16xbf16>
    %9 = arith.truncf %7 : vector<16x8xf32> to vector<16x8xbf16>
    %cst_12 = arith.constant dense<0.000000e+00> : vector<16x16xf32>
    %10 = tpu.matmul %9, %8, %cst_12 {dimension_numbers = #tpu.dot_dimension_numbers<[1], [0], [0], [1], [0, 0, 1, 1], [], []>} : vector<16x8xbf16>, vector<8x16xbf16>, vector<16x16xf32> -> vector<16x16xf32>
    %c8 = arith.constant 8 : index
    %c0_13 = arith.constant 0 : index
    %11 = vector.load %arg4[%c8, %c0_13] : memref<144x128xbf16, #tpu.memory_space<vmem>>, vector<8x16xbf16>
    %cst_14 = arith.constant dense<0.000000e+00> : vector<16x16xf32>
    %12 = tpu.matmul %1, %11, %cst_14 {dimension_numbers = #tpu.dot_dimension_numbers<[1], [0], [0], [1], [0, 0, 1, 1], [], []>} : vector<16x8xbf16>, vector<8x16xbf16>, vector<16x16xf32> -> vector<16x16xf32>
    %13 = arith.addf %10, %12 : vector<16x16xf32>
    %14 = vector.extract_strided_slice %6 {offsets = [0, 0], sizes = [1, 16], strides = [1, 1]} : vector<8x128xf32> to vector<1x16xf32>
    %15 = vector.broadcast %14 : vector<1x16xf32> to vector<16x16xf32>
    %16 = arith.addf %13, %15 : vector<16x16xf32>
    %cst_15 = arith.constant 0.000000e+00 : f32
    %17 = vector.broadcast %cst_15 : f32 to vector<16x16xf32>
    %18 = arith.maximumf %16, %17 : vector<16x16xf32>
    %cst_16 = arith.constant dense<0.000000e+00> : vector<16xf32>
    %19 = vector.multi_reduction <add>, %18, %cst_16 [0] : vector<16x16xf32> to vector<16xf32>
    %20 = vector.shape_cast %19 : vector<16xf32> to vector<1x16xf32>
    %cst_17 = arith.constant 1.600000e+01 : f32
    %21 = vector.broadcast %cst_17 : f32 to vector<1x16xf32>
    %22 = arith.divf %20, %21 : vector<1x16xf32>
    %23 = vector.broadcast %22 : vector<1x16xf32> to vector<16x16xf32>
    %24 = arith.subf %18, %23 : vector<16x16xf32>
    %25 = arith.mulf %24, %24 : vector<16x16xf32>
    %cst_18 = arith.constant dense<0.000000e+00> : vector<16xf32>
    %26 = vector.multi_reduction <add>, %25, %cst_18 [0] : vector<16x16xf32> to vector<16xf32>
    %27 = vector.shape_cast %26 : vector<16xf32> to vector<1x16xf32>
    %cst_19 = arith.constant 1.600000e+01 : f32
    %28 = vector.broadcast %cst_19 : f32 to vector<1x16xf32>
    %29 = arith.divf %27, %28 : vector<1x16xf32>
    %30 = vector.broadcast %22 : vector<1x16xf32> to vector<16x16xf32>
    %31 = arith.subf %18, %30 : vector<16x16xf32>
    %cst_20 = arith.constant 9.99999974E-6 : f32
    %32 = vector.broadcast %cst_20 : f32 to vector<1x16xf32>
    %33 = arith.addf %29, %32 : vector<1x16xf32>
    %34 = math.rsqrt %33 : vector<1x16xf32>
    %35 = vector.broadcast %34 : vector<1x16xf32> to vector<16x16xf32>
    %36 = arith.mulf %31, %35 : vector<16x16xf32>
    %37 = vector.extract_strided_slice %6 {offsets = [6, 0], sizes = [1, 16], strides = [1, 1]} : vector<8x128xf32> to vector<1x16xf32>
    %38 = vector.broadcast %37 : vector<1x16xf32> to vector<16x16xf32>
    %39 = arith.mulf %36, %38 : vector<16x16xf32>
    %40 = vector.extract_strided_slice %6 {offsets = [7, 0], sizes = [1, 16], strides = [1, 1]} : vector<8x128xf32> to vector<1x16xf32>
    %41 = vector.broadcast %40 : vector<1x16xf32> to vector<16x16xf32>
    %42 = arith.addf %39, %41 : vector<16x16xf32>
    %cst_21 = arith.constant dense<0.000000e+00> : vector<16x16xf32>
    %43 = tpu.matmul %3, %42, %cst_21 {dimension_numbers = #tpu.dot_dimension_numbers<[1], [0], [0], [1], [0, 0, 1, 1], [], []>} : vector<16x16xbf16>, vector<16x16xf32>, vector<16x16xf32> -> vector<16x16xf32>
    %c16 = arith.constant 16 : index
    %c0_22 = arith.constant 0 : index
    %44 = vector.load %arg4[%c16, %c0_22] : memref<144x128xbf16, #tpu.memory_space<vmem>>, vector<16x16xbf16>
    %45 = arith.truncf %43 : vector<16x16xf32> to vector<16x16xbf16>
    %cst_23 = arith.constant dense<0.000000e+00> : vector<16x16xf32>
    %46 = tpu.matmul %45, %44, %cst_23 {dimension_numbers = #tpu.dot_dimension_numbers<[1], [0], [0], [1], [0, 0, 1, 1], [], []>} : vector<16x16xbf16>, vector<16x16xbf16>, vector<16x16xf32> -> vector<16x16xf32>
    %c32 = arith.constant 32 : index
    %c0_24 = arith.constant 0 : index
    %47 = vector.load %arg4[%c32, %c0_24] : memref<144x128xbf16, #tpu.memory_space<vmem>>, vector<16x16xbf16>
    %48 = arith.truncf %42 : vector<16x16xf32> to vector<16x16xbf16>
    %cst_25 = arith.constant dense<0.000000e+00> : vector<16x16xf32>
    %49 = tpu.matmul %48, %47, %cst_25 {dimension_numbers = #tpu.dot_dimension_numbers<[1], [0], [0], [1], [0, 0, 1, 1], [], []>} : vector<16x16xbf16>, vector<16x16xbf16>, vector<16x16xf32> -> vector<16x16xf32>
    %50 = arith.addf %46, %49 : vector<16x16xf32>
    %51 = vector.extract_strided_slice %6 {offsets = [1, 0], sizes = [1, 16], strides = [1, 1]} : vector<8x128xf32> to vector<1x16xf32>
    %52 = vector.broadcast %51 : vector<1x16xf32> to vector<16x16xf32>
    %53 = arith.addf %50, %52 : vector<16x16xf32>
    %cst_26 = arith.constant 0.000000e+00 : f32
    %54 = vector.broadcast %cst_26 : f32 to vector<16x16xf32>
    %55 = arith.maximumf %53, %54 : vector<16x16xf32>
    %cst_27 = arith.constant dense<0.000000e+00> : vector<2x16xf32>
    %56 = tpu.matmul %5, %55, %cst_27 {dimension_numbers = #tpu.dot_dimension_numbers<[1], [0], [0], [1], [0, 0, 1, 1], [], []>} : vector<2x16xbf16>, vector<16x16xf32>, vector<2x16xf32> -> vector<2x16xf32>
    %cst_28 = arith.constant dense<0.000000e+00> : vector<16xf32>
    %57 = vector.multi_reduction <add>, %56, %cst_28 [0] : vector<2x16xf32> to vector<16xf32>
    %58 = vector.shape_cast %57 : vector<16xf32> to vector<1x16xf32>
    %cst_29 = arith.constant 2.000000e+00 : f32
    %59 = vector.broadcast %cst_29 : f32 to vector<1x16xf32>
    %60 = arith.divf %58, %59 : vector<1x16xf32>
    %61 = vector.broadcast %60 : vector<1x16xf32> to vector<2x16xf32>
    %62 = arith.subf %56, %61 : vector<2x16xf32>
    %63 = arith.mulf %62, %62 : vector<2x16xf32>
    %cst_30 = arith.constant dense<0.000000e+00> : vector<16xf32>
    %64 = vector.multi_reduction <add>, %63, %cst_30 [0] : vector<2x16xf32> to vector<16xf32>
    %65 = vector.shape_cast %64 : vector<16xf32> to vector<1x16xf32>
    %cst_31 = arith.constant 2.000000e+00 : f32
    %66 = vector.broadcast %cst_31 : f32 to vector<1x16xf32>
    %67 = arith.divf %65, %66 : vector<1x16xf32>
    %68 = vector.broadcast %60 : vector<1x16xf32> to vector<2x16xf32>
    %69 = arith.subf %56, %68 : vector<2x16xf32>
    %cst_32 = arith.constant 9.99999974E-6 : f32
    %70 = vector.broadcast %cst_32 : f32 to vector<1x16xf32>
    %71 = arith.addf %67, %70 : vector<1x16xf32>
    %72 = math.rsqrt %71 : vector<1x16xf32>
    %73 = vector.broadcast %72 : vector<1x16xf32> to vector<2x16xf32>
    %74 = arith.mulf %69, %73 : vector<2x16xf32>
    %c48 = arith.constant 48 : index
    %c0_33 = arith.constant 0 : index
    %75 = vector.load %arg4[%c48, %c0_33] : memref<144x128xbf16, #tpu.memory_space<vmem>>, vector<16x16xbf16>
    %76 = arith.truncf %74 : vector<2x16xf32> to vector<2x16xbf16>
    %cst_34 = arith.constant dense<0.000000e+00> : vector<2x16xf32>
    %77 = tpu.matmul %76, %75, %cst_34 {dimension_numbers = #tpu.dot_dimension_numbers<[1], [0], [0], [1], [0, 0, 1, 1], [], []>} : vector<2x16xbf16>, vector<16x16xbf16>, vector<2x16xf32> -> vector<2x16xf32>
    %78 = vector.extract_strided_slice %6 {offsets = [2, 0], sizes = [1, 16], strides = [1, 1]} : vector<8x128xf32> to vector<1x16xf32>
    %79 = vector.broadcast %78 : vector<1x16xf32> to vector<2x16xf32>
    %80 = arith.addf %77, %79 : vector<2x16xf32>
    %cst_35 = arith.constant 0.000000e+00 : f32
    %81 = vector.broadcast %cst_35 : f32 to vector<2x16xf32>
    %82 = arith.maximumf %80, %81 : vector<2x16xf32>
    %cst_36 = arith.constant dense<0.000000e+00> : vector<16xf32>
    %83 = vector.multi_reduction <add>, %82, %cst_36 [0] : vector<2x16xf32> to vector<16xf32>
    %84 = vector.shape_cast %83 : vector<16xf32> to vector<1x16xf32>
    %cst_37 = arith.constant 2.000000e+00 : f32
    %85 = vector.broadcast %cst_37 : f32 to vector<1x16xf32>
    %86 = arith.divf %84, %85 : vector<1x16xf32>
    %87 = vector.broadcast %86 : vector<1x16xf32> to vector<2x16xf32>
    %88 = arith.subf %82, %87 : vector<2x16xf32>
    %89 = arith.mulf %88, %88 : vector<2x16xf32>
    %cst_38 = arith.constant dense<0.000000e+00> : vector<16xf32>
    %90 = vector.multi_reduction <add>, %89, %cst_38 [0] : vector<2x16xf32> to vector<16xf32>
    %91 = vector.shape_cast %90 : vector<16xf32> to vector<1x16xf32>
    %cst_39 = arith.constant 2.000000e+00 : f32
    %92 = vector.broadcast %cst_39 : f32 to vector<1x16xf32>
    %93 = arith.divf %91, %92 : vector<1x16xf32>
    %94 = vector.broadcast %86 : vector<1x16xf32> to vector<2x16xf32>
    %95 = arith.subf %82, %94 : vector<2x16xf32>
    %cst_40 = arith.constant 9.99999974E-6 : f32
    %96 = vector.broadcast %cst_40 : f32 to vector<1x16xf32>
    %97 = arith.addf %93, %96 : vector<1x16xf32>
    %98 = math.rsqrt %97 : vector<1x16xf32>
    %99 = vector.broadcast %98 : vector<1x16xf32> to vector<2x16xf32>
    %100 = arith.mulf %95, %99 : vector<2x16xf32>
    %c64 = arith.constant 64 : index
    %c0_41 = arith.constant 0 : index
    %101 = vector.load %arg4[%c64, %c0_41] : memref<144x128xbf16, #tpu.memory_space<vmem>>, vector<16x16xbf16>
    %102 = arith.truncf %100 : vector<2x16xf32> to vector<2x16xbf16>
    %cst_42 = arith.constant dense<0.000000e+00> : vector<2x16xf32>
    %103 = tpu.matmul %102, %101, %cst_42 {dimension_numbers = #tpu.dot_dimension_numbers<[1], [0], [0], [1], [0, 0, 1, 1], [], []>} : vector<2x16xbf16>, vector<16x16xbf16>, vector<2x16xf32> -> vector<2x16xf32>
    %c80 = arith.constant 80 : index
    %c0_43 = arith.constant 0 : index
    %104 = vector.load %arg4[%c80, %c0_43] : memref<144x128xbf16, #tpu.memory_space<vmem>>, vector<16x16xbf16>
    %105 = arith.truncf %74 : vector<2x16xf32> to vector<2x16xbf16>
    %cst_44 = arith.constant dense<0.000000e+00> : vector<2x16xf32>
    %106 = tpu.matmul %105, %104, %cst_44 {dimension_numbers = #tpu.dot_dimension_numbers<[1], [0], [0], [1], [0, 0, 1, 1], [], []>} : vector<2x16xbf16>, vector<16x16xbf16>, vector<2x16xf32> -> vector<2x16xf32>
    %107 = arith.addf %103, %106 : vector<2x16xf32>
    %108 = vector.extract_strided_slice %6 {offsets = [3, 0], sizes = [1, 16], strides = [1, 1]} : vector<8x128xf32> to vector<1x16xf32>
    %109 = vector.broadcast %108 : vector<1x16xf32> to vector<2x16xf32>
    %110 = arith.addf %107, %109 : vector<2x16xf32>
    %cst_45 = arith.constant 0.000000e+00 : f32
    %111 = vector.broadcast %cst_45 : f32 to vector<2x16xf32>
    %112 = arith.maximumf %110, %111 : vector<2x16xf32>
    %cst_46 = arith.constant dense<0.000000e+00> : vector<16xf32>
    %113 = vector.multi_reduction <add>, %112, %cst_46 [0] : vector<2x16xf32> to vector<16xf32>
    %114 = vector.shape_cast %113 : vector<16xf32> to vector<1x16xf32>
    %cst_47 = arith.constant 2.000000e+00 : f32
    %115 = vector.broadcast %cst_47 : f32 to vector<1x16xf32>
    %116 = arith.divf %114, %115 : vector<1x16xf32>
    %117 = vector.broadcast %116 : vector<1x16xf32> to vector<2x16xf32>
    %118 = arith.subf %112, %117 : vector<2x16xf32>
    %119 = arith.mulf %118, %118 : vector<2x16xf32>
    %cst_48 = arith.constant dense<0.000000e+00> : vector<16xf32>
    %120 = vector.multi_reduction <add>, %119, %cst_48 [0] : vector<2x16xf32> to vector<16xf32>
    %121 = vector.shape_cast %120 : vector<16xf32> to vector<1x16xf32>
    %cst_49 = arith.constant 2.000000e+00 : f32
    %122 = vector.broadcast %cst_49 : f32 to vector<1x16xf32>
    %123 = arith.divf %121, %122 : vector<1x16xf32>
    %124 = vector.broadcast %116 : vector<1x16xf32> to vector<2x16xf32>
    %125 = arith.subf %112, %124 : vector<2x16xf32>
    %cst_50 = arith.constant 9.99999974E-6 : f32
    %126 = vector.broadcast %cst_50 : f32 to vector<1x16xf32>
    %127 = arith.addf %123, %126 : vector<1x16xf32>
    %128 = math.rsqrt %127 : vector<1x16xf32>
    %129 = vector.broadcast %128 : vector<1x16xf32> to vector<2x16xf32>
    %130 = arith.mulf %125, %129 : vector<2x16xf32>
    %c96 = arith.constant 96 : index
    %c0_51 = arith.constant 0 : index
    %131 = vector.load %arg4[%c96, %c0_51] : memref<144x128xbf16, #tpu.memory_space<vmem>>, vector<16x16xbf16>
    %132 = arith.truncf %130 : vector<2x16xf32> to vector<2x16xbf16>
    %cst_52 = arith.constant dense<0.000000e+00> : vector<2x16xf32>
    %133 = tpu.matmul %132, %131, %cst_52 {dimension_numbers = #tpu.dot_dimension_numbers<[1], [0], [0], [1], [0, 0, 1, 1], [], []>} : vector<2x16xbf16>, vector<16x16xbf16>, vector<2x16xf32> -> vector<2x16xf32>
    %c112 = arith.constant 112 : index
    %c0_53 = arith.constant 0 : index
    %134 = vector.load %arg4[%c112, %c0_53] : memref<144x128xbf16, #tpu.memory_space<vmem>>, vector<16x16xbf16>
    %135 = arith.truncf %74 : vector<2x16xf32> to vector<2x16xbf16>
    %cst_54 = arith.constant dense<0.000000e+00> : vector<2x16xf32>
    %136 = tpu.matmul %135, %134, %cst_54 {dimension_numbers = #tpu.dot_dimension_numbers<[1], [0], [0], [1], [0, 0, 1, 1], [], []>} : vector<2x16xbf16>, vector<16x16xbf16>, vector<2x16xf32> -> vector<2x16xf32>
    %137 = arith.addf %133, %136 : vector<2x16xf32>
    %138 = vector.extract_strided_slice %6 {offsets = [4, 0], sizes = [1, 16], strides = [1, 1]} : vector<8x128xf32> to vector<1x16xf32>
    %139 = vector.broadcast %138 : vector<1x16xf32> to vector<2x16xf32>
    %140 = arith.addf %137, %139 : vector<2x16xf32>
    %cst_55 = arith.constant 0.000000e+00 : f32
    %141 = vector.broadcast %cst_55 : f32 to vector<2x16xf32>
    %142 = arith.maximumf %140, %141 : vector<2x16xf32>
    %c128 = arith.constant 128 : index
    %c0_56 = arith.constant 0 : index
    %143 = vector.load %arg4[%c128, %c0_56] : memref<144x128xbf16, #tpu.memory_space<vmem>>, vector<16x128xbf16>
    %144 = arith.truncf %142 : vector<2x16xf32> to vector<2x16xbf16>
    %cst_57 = arith.constant dense<0.000000e+00> : vector<2x128xf32>
    %145 = tpu.matmul %144, %143, %cst_57 {dimension_numbers = #tpu.dot_dimension_numbers<[1], [0], [0], [1], [0, 0, 1, 1], [], []>} : vector<2x16xbf16>, vector<16x128xbf16>, vector<2x128xf32> -> vector<2x128xf32>
    %146 = vector.extract_strided_slice %6 {offsets = [5, 0], sizes = [1, 128], strides = [1, 1]} : vector<8x128xf32> to vector<1x128xf32>
    %147 = vector.broadcast %146 : vector<1x128xf32> to vector<2x128xf32>
    %148 = arith.addf %145, %147 : vector<2x128xf32>
    %149 = tpu.iota {dimensions = array<i32: 1>} : vector<2x128xi32>
    %c6_i32 = arith.constant 6 : i32
    %150 = vector.broadcast %c6_i32 : i32 to vector<2x128xi32>
    %151 = arith.cmpi slt, %149, %150 : vector<2x128xi32>
    %c6_i32_58 = arith.constant 6 : i32
    %152 = vector.broadcast %c6_i32_58 : i32 to vector<2x128xi32>
    %153 = arith.cmpi sge, %149, %152 : vector<2x128xi32>
    %c11_i32 = arith.constant 11 : i32
    %154 = vector.broadcast %c11_i32 : i32 to vector<2x128xi32>
    %155 = arith.cmpi slt, %149, %154 : vector<2x128xi32>
    %156 = arith.andi %153, %155 : vector<2x128xi1>
    %c11_i32_59 = arith.constant 11 : i32
    %157 = vector.broadcast %c11_i32_59 : i32 to vector<2x128xi32>
    %158 = arith.cmpi sge, %149, %157 : vector<2x128xi32>
    %c15_i32 = arith.constant 15 : i32
    %159 = vector.broadcast %c15_i32 : i32 to vector<2x128xi32>
    %160 = arith.cmpi slt, %149, %159 : vector<2x128xi32>
    %161 = arith.andi %158, %160 : vector<2x128xi1>
    %162 = arith.ori %156, %161 : vector<2x128xi1>
    %163 = arith.ori %151, %162 : vector<2x128xi1>
    %cst_60 = arith.constant -1.000000e+30 : f32
    %164 = vector.broadcast %cst_60 : f32 to vector<2x128xf32>
    %165 = arith.select %151, %148, %164 : vector<2x128xi1>, vector<2x128xf32>
    %cst_61 = arith.constant dense<0xFF800000> : vector<2xf32>
    %166 = vector.multi_reduction <maximumf>, %165, %cst_61 [1] : vector<2x128xf32> to vector<2xf32>
    %167 = vector.shape_cast %166 : vector<2xf32> to vector<2x1xf32>
    %cst_62 = arith.constant -1.000000e+30 : f32
    %168 = vector.broadcast %cst_62 : f32 to vector<2x128xf32>
    %169 = arith.select %156, %148, %168 : vector<2x128xi1>, vector<2x128xf32>
    %cst_63 = arith.constant dense<0xFF800000> : vector<2xf32>
    %170 = vector.multi_reduction <maximumf>, %169, %cst_63 [1] : vector<2x128xf32> to vector<2xf32>
    %171 = vector.shape_cast %170 : vector<2xf32> to vector<2x1xf32>
    %cst_64 = arith.constant -1.000000e+30 : f32
    %172 = vector.broadcast %cst_64 : f32 to vector<2x128xf32>
    %173 = arith.select %161, %148, %172 : vector<2x128xi1>, vector<2x128xf32>
    %cst_65 = arith.constant dense<0xFF800000> : vector<2xf32>
    %174 = vector.multi_reduction <maximumf>, %173, %cst_65 [1] : vector<2x128xf32> to vector<2xf32>
    %175 = vector.shape_cast %174 : vector<2xf32> to vector<2x1xf32>
    %176 = vector.shape_cast %171 : vector<2x1xf32> to vector<2x1xf32>
    %177 = vector.broadcast %176 : vector<2x1xf32> to vector<2x128xf32>
    %178 = vector.shape_cast %175 : vector<2x1xf32> to vector<2x1xf32>
    %179 = vector.broadcast %178 : vector<2x1xf32> to vector<2x128xf32>
    %180 = arith.select %156, %177, %179 : vector<2x128xi1>, vector<2x128xf32>
    %181 = vector.shape_cast %167 : vector<2x1xf32> to vector<2x1xf32>
    %182 = vector.broadcast %181 : vector<2x1xf32> to vector<2x128xf32>
    %183 = arith.select %151, %182, %180 : vector<2x128xi1>, vector<2x128xf32>
    %184 = arith.subf %148, %183 : vector<2x128xf32>
    %185 = math.exp %184 : vector<2x128xf32>
    %cst_66 = arith.constant 0.000000e+00 : f32
    %186 = vector.broadcast %cst_66 : f32 to vector<2x128xf32>
    %187 = arith.select %163, %185, %186 : vector<2x128xi1>, vector<2x128xf32>
    %cst_67 = arith.constant 0.000000e+00 : f32
    %188 = vector.broadcast %cst_67 : f32 to vector<2x128xf32>
    %189 = arith.select %151, %187, %188 : vector<2x128xi1>, vector<2x128xf32>
    %cst_68 = arith.constant dense<0.000000e+00> : vector<2xf32>
    %190 = vector.multi_reduction <add>, %189, %cst_68 [1] : vector<2x128xf32> to vector<2xf32>
    %191 = vector.shape_cast %190 : vector<2xf32> to vector<2x1xf32>
    %cst_69 = arith.constant 0.000000e+00 : f32
    %192 = vector.broadcast %cst_69 : f32 to vector<2x128xf32>
    %193 = arith.select %156, %187, %192 : vector<2x128xi1>, vector<2x128xf32>
    %cst_70 = arith.constant dense<0.000000e+00> : vector<2xf32>
    %194 = vector.multi_reduction <add>, %193, %cst_70 [1] : vector<2x128xf32> to vector<2xf32>
    %195 = vector.shape_cast %194 : vector<2xf32> to vector<2x1xf32>
    %cst_71 = arith.constant 0.000000e+00 : f32
    %196 = vector.broadcast %cst_71 : f32 to vector<2x128xf32>
    %197 = arith.select %161, %187, %196 : vector<2x128xi1>, vector<2x128xf32>
    %cst_72 = arith.constant dense<0.000000e+00> : vector<2xf32>
    %198 = vector.multi_reduction <add>, %197, %cst_72 [1] : vector<2x128xf32> to vector<2xf32>
    %199 = vector.shape_cast %198 : vector<2xf32> to vector<2x1xf32>
    %200 = vector.shape_cast %195 : vector<2x1xf32> to vector<2x1xf32>
    %201 = vector.broadcast %200 : vector<2x1xf32> to vector<2x128xf32>
    %202 = vector.shape_cast %199 : vector<2x1xf32> to vector<2x1xf32>
    %203 = vector.broadcast %202 : vector<2x1xf32> to vector<2x128xf32>
    %204 = arith.select %156, %201, %203 : vector<2x128xi1>, vector<2x128xf32>
    %205 = vector.shape_cast %191 : vector<2x1xf32> to vector<2x1xf32>
    %206 = vector.broadcast %205 : vector<2x1xf32> to vector<2x128xf32>
    %207 = arith.select %151, %206, %204 : vector<2x128xi1>, vector<2x128xf32>
    %208 = arith.divf %187, %207 : vector<2x128xf32>
    %c0_73 = arith.constant 0 : index
    %c0_74 = arith.constant 0 : index
    %c0_75 = arith.constant 0 : index
    %209 = vector.load %arg6[%c0_73, %c0_74, %c0_75] : memref<1x2x128xf32, #tpu.memory_space<vmem>>, vector<1x2x128xf32>
    %210 = vector.shape_cast %209 : vector<1x2x128xf32> to vector<2x128xf32>
    %211 = vector.shape_cast %208 : vector<2x128xf32> to vector<1x2x128xf32>
    tpu.vector_store %arg6[%c0_73, %c0_74, %c0_75], %211 {strides = array<i32>} : memref<1x2x128xf32, #tpu.memory_space<vmem>>, vector<1x2x128xf32>,
    return
  }
  func.func @transform_0(%arg0: i32) -> (i32, i32, i32) {
    %c0_i32 = arith.constant 0 : i32
    %c0_i32_0 = arith.constant 0 : i32
    %c0_i32_1 = arith.constant 0 : i32
    return %arg0, %c0_i32, %c0_i32_0 : i32, i32, i32
  }
  func.func @transform_1(%arg0: i32) -> (i32, i32, i32) {
    %c0_i32 = arith.constant 0 : i32
    %c0_i32_0 = arith.constant 0 : i32
    %c0_i32_1 = arith.constant 0 : i32
    return %arg0, %c0_i32, %c0_i32_0 : i32, i32, i32
  }
  func.func @transform_2(%arg0: i32) -> (i32, i32, i32) {
    %c0_i32 = arith.constant 0 : i32
    %c0_i32_0 = arith.constant 0 : i32
    %c0_i32_1 = arith.constant 0 : i32
    return %arg0, %c0_i32, %c0_i32_0 : i32, i32, i32
  }
  func.func @transform_3(%arg0: i32) -> (i32, i32) {
    %c0_i32 = arith.constant 0 : i32
    %c0_i32_0 = arith.constant 0 : i32
    %c0_i32_1 = arith.constant 0 : i32
    return %c0_i32, %c0_i32_0 : i32, i32
  }
  func.func @transform_4(%arg0: i32) -> (i32, i32) {
    %c0_i32 = arith.constant 0 : i32
    %c0_i32_0 = arith.constant 0 : i32
    %c0_i32_1 = arith.constant 0 : i32
    return %c0_i32, %c0_i32_0 : i32, i32
  }
  func.func @transform_5(%arg0: i32) -> (i32, i32, i32) {
    %c0_i32 = arith.constant 0 : i32
    %c0_i32_0 = arith.constant 0 : i32
    %c0_i32_1 = arith.constant 0 : i32
    return %arg0, %c0_i32, %c0_i32_0 : i32, i32, i32
  }
}

</mosaic_0001>

<bundles_post_ra>
// kernel: d2rl_actor_apply.1
= control target key start
LH: loop header
LB: loop body
LE: loop exit
PB: predicated region body
PF: predicated region fallthrough
CT: control target
= control target key end

     0   :  { %10 = vsyncpa [#allocation3], 0  ;;  %s1545_s18 = smov 0   ;;  %s1737_s0 = inlined_call_operand.vmem [shape: bf16[4,16,8], index: 0, kind: input, shape index: {}]   ;;  %s1738_s1 = inlined_call_operand.vmem [shape: bf16[4,16,16], index: 1, kind: input, shape index: {}]   ;;  %s1739_s2 = inlined_call_operand.vmem [shape: bf16[4,2,16], index: 2, kind: input, shape index: {}]   ;;  %s1740_s3 = inlined_call_operand.hbm [shape: bf16[144,128], index: 3, kind: input, shape index: {}]   ;;  %s1741_s4 = inlined_call_operand.vmem [shape: f32[8,128], index: 4, kind: input, shape index: {}]   ;;  %s1742_s5 = inlined_call_operand.vmem [shape: f32[4,2,128], index: 5, kind: output, shape index: {}]  }
   0x1 LB: > { %s1551_s19 = sadd.s32 4294967295, %s1507_s18   ;;  %p1270_p0 = scmp.ge.s32.totalorder %s1507_s18, 1  ;;  %s1507_s18 = sphi %s1545_s18, %s16_s18  }
   0x2   : > { %p167_p1 = scmp.lt.s32.totalorder %s1507_s18, 5  ;;  %s1509_s20 = smov [#allocation2]  }
   0x3   : > { %s179_s21 = sshll.u32 %s1509_s20, 4  ;;  %p1743_p3 = scmp.eq.s32.totalorder %s1551_s19, 0  ;;  %s180_s21 = int_to_ptr.vmem [resolvable:$true] %s179_s21 }
   0x4   : > { %p1555_p2 = pnand %p1270_p0, %p167_p1  ;;  %s1469_s26 = scalar_lea.hbm %s1740_s3, 1152 }
   0x5   : > { %p1470_p6 = scmp.ne.s32.totalorder %s1740_s3, %s1469_s26  ;;  %p1476_p10 = scmp.lt.u32.totalorder %s1469_s26, %s1740_s3 }
   0x6   : > { %s1745_s22 = scalar_select %p1555_p2, 1, 0 }
   0x7   : > { %p1427_p4 = pneg %p1555_p2 }
   0x9   : > { %p1564_p5 = pnand %p1743_p3, %p1427_p4 }
   0xb   : > { %p1471_p7 = pneg %p1564_p5 }
   0xd   : > { %p1472_p8 = pnand %p1471_p7, %p1470_p6 }
   0xf   : > { %p1473_p9 = pneg %p1472_p8 }
  0x11   : > { %p1478_p11 = pnand %p1476_p10, %p1473_p9 }
  0x13   : > { %1481 = shalt.err (!%p1478_p11)
}
  0x14   : > { %s1482_s6 = scalar_lea.vmem %s180_s21, 1152  ;;  %p1490_p1 = scmp.lt.s32.totalorder %s180_s21, %s180_s21 }
  0x15   : > { %p1483_p12 = scmp.ne.s32.totalorder %s180_s21, %s1482_s6  ;;  %p1491_p4 = scmp.lt.s32.totalorder %s1482_s6, %s1482_s6 }
  0x17   : > { %p1485_p13 = pnand %p1483_p12, %p1471_p7  ;;  %p1492_p3 = por %p1491_p4, %p1490_p1 }
  0x19   : > { %p1486_p0 = pneg %p1485_p13 }
  0x1b   : > { %p1493_p2 = pnand %p1492_p3, %p1486_p0 }
  0x1d   : > { %1496 = shalt.err (!%p1493_p2)
}
  0x1e   : > { %s1510_s7 = smov 64   ;;  %s1511_s8 = smov 4  }
  0x1f   : > { %1430 = dma.hbm_to_vmem [thread:$0]  (!%p1564_p5), %s1740_s3, 1152, %s180_s21, [#allocation3], %s1510_s7, %s1510_s7, %s1511_s8  }
  0x20   : > { %p1747_p6 = scmp.ne.s32.totalorder %s1745_s22, 0 }
  0x21   : > { %p1748_p8 = scmp.eq.s32.totalorder (!%p1747_p6), %s1551_s19, 0 }
  0x22   : > { %220 = sbr.rel (%p1747_p6) target bundleno = 2552 (0x9f8), region = 40 }
  0x29   : > { %1502 = dma.done.wait (%p1748_p8), [#allocation3], 1152   ;;  %p1749_p7 = pmov %p1748_p8 }
  0x2a   : > { %p255_p2 = scmp.lt.s32.totalorder %s1551_s19, 3  ;;  %v1512_v0 = vmov 0.0   ;;  %vm1513_vm0 = vmmov 0   ;;  %vm342_vm1 = vcmask 1043456   ;;  %vm290_vm2 = vcmask 130048   ;;  %v1449_v16 = vld [vmem:[#allocation2 + $0x10] sm:$0xff]  }
  0x2b   : > { %1504 = vsyncadd (%p1749_p7), [#allocation3], 4294966144  ;;  %1335 = vmatprep.subr.bf16.mxu0 %v1512_v0  ;;  %1337 = vmatprep.mubr.msk.bf16.mxu0 %vm1513_vm0, %v1512_v0  ;;  %v335_v3 = vld [vmem:[#allocation2] sm:$0xf]  ;;  %v337_v4 = vld [vmem:[#allocation2 + $0x4] sm:$0xf]  ;;  %v434_v18 = vlaneseq }
  0x2c   : > { %s1755_s19 = smov (!%p255_p2, %s1551_s19), 3  ;;  %1341 = vmatprep.subr.bf16.mxu1 %v1512_v0  ;;  %1343 = vmatprep.mubr.msk.bf16.mxu1 %vm1513_vm0, %v1512_v0  ;;  %v344_v5 = vsel %vm342_vm1, %v337_v4, 0  ;;  %v391_v6 = vsel %vm342_vm1, %v335_v3, 0  ;;  %vm338_vm3 = vcmask 64512   ;;  %v1514_v17 = vmov 0.0|0.0   ;;  %v1626_v21 = vld [vmem:[%s1741_s4] sm:$0xff] }
  0x2d   : > { %s1305_s11 = sshll.u32 %s1755_s19, 3  ;;  %1342 = vmatpush3.bf16.msra.mxu1 %v344_v5  ;;  %v1620_v19 = vshrl.u32 %v434_v18, 7  ;;  %s267_s24 = scalar_lea.vmem %s1739_s2, %s1755_s19  ;;  %vm745_vm4 = vcmask 123904   ;;  %vm1147_vm11 = vcmask 1041408  }
  0x2e   : > { %s259_s14 = scalar_lea.vmem %s1737_s0, %s1305_s11  ;;  %s264_s17 = scalar_lea.vmem %s1738_s1, %s1305_s11  ;;  %1417 = vmatprep.subr.bf16.mxu1 %v1514_v17 }
  0x2f   : > { %v1447_v1 = vld [vmem:[%s259_s14] sm:$0xff]   ;;  %v436_v20 = vsub.s32 0, %v1620_v19  ;;  %v473_v58 = vsub.s32 6, %v1620_v19  ;;  %v479_v59 = vsub.s32 7, %v1620_v19  ;;  %s1279_s25 = sshll.u32 %s1755_s19, 1 }
  0x30   : > { %v1607_v2 = vld [vmem:[%s264_s17] sm:$0xff]   ;;  %1336 = vmatpush3.bf16.msra.mxu0 %v1447_v1  ;;  %1344 = vmatmul.mubr.msk.bf16.vlgmr.msra.gmra.mrb[0].mxu1 %vm338_vm3, %v1447_v1  ;;  %s271_s28 = scalar_lea.vmem %s1742_s5, %s1279_s25 }
  0x31   : > { %1347 = vmatprep.subr.bf16.mxu0 %v1512_v0  ;;  %1357 = vmatprep.mubr.msk.bf16.mxu1 %vm1513_vm0, %v1512_v0  ;;  %v437_v22 = vrot.slane %v1626_v21, %v436_v20  ;;  %v474_v60 = vrot.slane %v1626_v21, %v473_v58  ;;  %v480_v1 = vrot.slane %v1626_v21, %v479_v59 }
  0x33   : > { %1338 = vmatmul.mubr.msk.bf16.vlgmr.msra.gmra.mrb[0].mxu0 %vm290_vm2, %v1607_v2 }
  0x34   : > { %1348 = vmatpush3.bf16.msra.mxu0 %v391_v6  ;;  %1349 = vmatprep.mubr.msk.bf16.mxu0 %vm1513_vm0, %v1512_v0 }
  0x35   : > { %1361 = vmatprep.subr.bf16.mxu0 %v1512_v0 }
 0x103   : > { %v380_v12 = vpop.f32.mrb[0].mxu1 }
 0x104   : > { %v1345_v13 = vpop.f32.mrb[1].mxu1 }
 0x105   : > { %v383_v14 = vpop.f32.mrb[2].mxu1 }
 0x106   : > { %v328_v7 = vpop.f32.mrb[0].mxu0  ;;  %v1346_v15 = vpop.f32.mrb[3].mxu1 }
 0x107   : > { %v1339_v8 = vpop.f32.mrb[1].mxu0 }
 0x108   : > { %v331_v9 = vpop.f32.mrb[2].mxu0  ;;  %v1450_v8 = vld [vmem:[#allocation2 + $0x8] sm:$0xff]  }
 0x109   : > { %v336_v10 = vpack.c.bf16 %v331_v9, %v328_v7  ;;  %v1340_v11 = vpop.f32.mrb[3].mxu0 }
 0x10b   : > { %1350 = vmatmul.mubr.msk.bf16.vlgmr.msra.gmra.mrb[4].mxu0 %vm338_vm3, %v336_v10 }
 0x10c   : > { %1363 = vmatprep.mubr.msk.bf16.mxu0 %vm1513_vm0, %v1512_v0  ;;  %1362 = vmatpush3.bf16.msra.mxu0 %v1449_v16 }
 0x10d   : > { %1420 = vmatprep.subr.bf16.mxu0 %v1514_v17 }
 0x1de   : > { %v427_v23 = vpop.f32.mrb[4].mxu0 }
 0x1df   : > { %v428_v24 = vadd.f32 %v427_v23, %v380_v12  ;;  %v1351_v25 = vpop.f32.mrb[5].mxu0 }
 0x1e0   : > { %v430_v26 = vpop.f32.mrb[6].mxu0 }
 0x1e1   : > { %v438_v27 = vadd.f32 %v437_v22, %v428_v24  ;;  %v431_v28 = vadd.f32 %v430_v26, %v383_v14  ;;  %v1352_v29 = vpop.f32.mrb[7].mxu0 }
 0x1e3   : > { %v440_v30 = vmax.f32 %v438_v27, 0.0  ;;  %v439_v31 = vadd.f32 %v437_v22, %v431_v28 }
 0x1e5   : > { %v441_v32 = vmax.f32 %v439_v31, 0.0  ;;  %v442_v33 = vsel %vm290_vm2, %v440_v30, 0.0 }
 0x1e7   : > { %v443_v34 = vsel %vm290_vm2, %v441_v32, 0.0 }
 0x1e8   : > { %v444_v35 = vadd.f32 %v443_v34, %v442_v33  ;;  %v277_v33 = vld [vmem:[%s267_s24] sm:$0x1]  ;;  %v1451_v34 = vld [vmem:[#allocation2 + $0x18] sm:$0xff]  }
 0x1ea   : > { %v445_v36 = vrot.slane %v444_v35, 4 }
 0x1ec   : > { %v446_v37 = vadd.f32 %v445_v36, %v444_v35  ;;  %v1452_v35 = vld [vmem:[#allocation2 + $0x28] sm:$0xff]  }
 0x1ee   : > { %v447_v38 = vrot.slane %v446_v37, 2 }
 0x1f0   : > { %v448_v39 = vadd.f32 %v447_v38, %v446_v37 }
 0x1f2   : > { %v449_v40 = vrot.slane %v448_v39, 1 }
 0x1f4   : > { %v450_v41 = vadd.f32 %v449_v40, %v448_v39 }
 0x1f6   : > { %v452_v42 = vmul.f32 0.0625, %v450_v41 }
 0x1f8   : > { %v453_v43 = vsub.f32 %v440_v30, %v452_v42  ;;  %v454_v44 = vsub.f32 %v441_v32, %v452_v42 }
 0x1fa   : > { %v455_v45 = vmul.f32 %v453_v43, %v453_v43  ;;  %v456_v46 = vmul.f32 %v454_v44, %v454_v44 }
 0x1fc   : > { %v457_v47 = vsel %vm290_vm2, %v455_v45, 0.0  ;;  %v458_v48 = vsel %vm290_vm2, %v456_v46, 0.0 }
 0x1fd   : > { %v459_v49 = vadd.f32 %v458_v48, %v457_v47 }
 0x1ff   : > { %v460_v50 = vrot.slane %v459_v49, 4 }
 0x201   : > { %v461_v51 = vadd.f32 %v460_v50, %v459_v49 }
 0x203   : > { %v462_v52 = vrot.slane %v461_v51, 2 }
 0x205   : > { %v463_v53 = vadd.f32 %v462_v52, %v461_v51 }
 0x207   : > { %v464_v54 = vrot.slane %v463_v53, 1 }
 0x209   : > { %v465_v55 = vadd.f32 %v464_v54, %v463_v53 }
 0x20b   : > { %v466_v56 = vmul.f32 0.0625, %v465_v55 }
 0x20d   : > { %v467_v57 = vadd.f32 1e-05, %v466_v56 }
 0x20f   : > { %1457 = vrsqrt.f32 %v467_v57 }
 0x219   : > { %v1458_v61 = vpop.eup %1457 }
 0x21a   : > { %v469_v62 = vmul.f32 %v1458_v61, %v453_v43  ;;  %v470_v63 = vmul.f32 %v1458_v61, %v454_v44  ;;  %v1453_v61 = vld [vmem:[#allocation2 + $0x38] sm:$0xff]  }
 0x21c   : > { %v476_v3 = vmul.f32 %v474_v60, %v470_v63  ;;  %v475_v4 = vmul.f32 %v474_v60, %v469_v62  ;;  %v1454_v63 = vld [vmem:[#allocation2 + $0x20] sm:$0xff]  }
 0x21e   : > { %v481_v5 = vadd.f32 %v480_v1, %v475_v4  ;;  %v482_v6 = vadd.f32 %v480_v1, %v476_v3  ;;  %v773_v1 = vsub.s32 2, %v1620_v19 }
 0x220   : > { %v1418_v7 = vpack.c.bf16 %v482_v6, %v481_v5  ;;  %v774_v3 = vrot.slane %v1626_v21, %v773_v1 }
 0x222   : > { %1419 = vmatpush3.bf16.msra.mxu1 %v1418_v7  ;;  %1364 = vmatmul.mubr.msk.bf16.vlgmr.msra.gmra.mrb[8].mxu0 %vm290_vm2, %v1418_v7 }
 0x223   : > { %1367 = vmatprep.subr.bf16.mxu1 %v1512_v0  ;;  %1377 = vmatprep.mubr.msk.bf16.mxu0 %vm1513_vm0, %v1512_v0 }
 0x225   : > { %1358 = vmatmul.mubr.msk.bf16.vlgmr.msra.gmra.mrb[4].mxu1 %vm290_vm2, %v1607_v2  ;;  %v664_v2 = vsub.s32 1, %v1620_v19 }
 0x226   : > { %1369 = vmatprep.mubr.msk.bf16.mxu1 %vm1513_vm0, %v1512_v0  ;;  %1368 = vmatpush3.bf16.msra.mxu1 %v1450_v8 }
 0x227   : > { %1381 = vmatprep.subr.bf16.mxu1 %v1512_v0  ;;  %v665_v20 = vrot.slane %v1626_v21, %v664_v2 }
 0x2f5   : > { %v605_v9 = vpop.f32.mrb[8].mxu0 }
 0x2f6   : > { %v1365_v10 = vpop.f32.mrb[9].mxu0 }
 0x2f7   : > { %v608_v11 = vpop.f32.mrb[10].mxu0 }
 0x2f8   : > { %v549_v12 = vpop.f32.mrb[4].mxu1  ;;  %v1366_v13 = vpop.f32.mrb[11].mxu0 }
 0x2f9   : > { %v1359_v14 = vpop.f32.mrb[5].mxu1 }
 0x2fa   : > { %v552_v15 = vpop.f32.mrb[6].mxu1 }
 0x2fb   : > { %v558_v16 = vpack.c.bf16 %v552_v15, %v549_v12  ;;  %v1360_v17 = vpop.f32.mrb[7].mxu1 }
 0x2fd   : > { %1370 = vmatmul.mubr.msk.bf16.vlgmr.msra.gmra.mrb[8].mxu1 %vm290_vm2, %v558_v16 }
 0x2fe   : > { %1383 = vmatprep.mubr.msk.bf16.mxu1 %vm1513_vm0, %v1512_v0  ;;  %1382 = vmatpush3.bf16.msra.mxu1 %v1451_v34 }
 0x2ff   : > { %1393 = vmatprep.subr.bf16.mxu1 %v1512_v0 }
 0x3d0   : > { %v655_v22 = vpop.f32.mrb[8].mxu1 }
 0x3d1   : > { %v656_v23 = vadd.f32 %v655_v22, %v605_v9  ;;  %v1371_v24 = vpop.f32.mrb[9].mxu1 }
 0x3d2   : > { %v658_v25 = vpop.f32.mrb[10].mxu1 }
 0x3d3   : > { %v666_v26 = vadd.f32 %v665_v20, %v656_v23  ;;  %v659_v27 = vadd.f32 %v658_v25, %v608_v11  ;;  %v1372_v28 = vpop.f32.mrb[11].mxu1 }
 0x3d5   : > { %v667_v29 = vadd.f32 %v665_v20, %v659_v27  ;;  %v668_v30 = vmax.f32 %v666_v26, 0.0 }
 0x3d7   : > { %v669_v31 = vmax.f32 %v667_v29, 0.0 }
 0x3d9   : > { %v1421_v32 = vpack.c.bf16 %v669_v31, %v668_v30 }
 0x3db   : > { %1422 = vmatpush3.bf16.msra.mxu0 %v1421_v32 }
 0x3dc   : > { %1387 = vmatprep.subr.bf16.mxu0 %v1512_v0 }
 0x3de   : > { %1378 = vmatmul.mubr.msk.bf16.vlgmr.msra.gmra.mrb[12].mxu0 %vm290_vm2, %v277_v33 }
 0x3df   : > { %1389 = vmatprep.mubr.msk.bf16.mxu0 %vm1513_vm0, %v1512_v0  ;;  %1388 = vmatpush3.bf16.msra.mxu0 %v1452_v35 }
 0x3e0   : > { %1399 = vmatprep.subr.bf16.mxu0 %v1512_v0 }
 0x4b1   : > { %v739_v36 = vpop.f32.mrb[12].mxu0 }
 0x4b2   : > { %v746_v37 = vsel %vm745_vm4, %v739_v36, 0.0  ;;  %v1379_v38 = vpop.f32.mrb[13].mxu0 }
 0x4b3   : > { %v747_v39 = vrot.slane %v746_v37, 4  ;;  %v742_v40 = vpop.f32.mrb[14].mxu0 }
 0x4b4   : > { %v1380_v41 = vpop.f32.mrb[15].mxu0 }
 0x4b5   : > { %v748_v42 = vadd.f32 %v747_v39, %v746_v37 }
 0x4b7   : > { %v749_v43 = vrot.slane %v748_v42, 2 }
 0x4b9   : > { %v750_v44 = vadd.f32 %v749_v43, %v748_v42  ;;  %v1455_v42 = vld [vmem:[#allocation2 + $0x30] sm:$0xff]   ;;  %v948_v43 = vsub.s32 3, %v1620_v19 }
 0x4bb   : > { %v751_v45 = vrot.slane %v750_v44, 1 }
 0x4bd   : > { %v752_v46 = vadd.f32 %v751_v45, %v750_v44  ;;  %v949_v44 = vrot.slane %v1626_v21, %v948_v43 }
 0x4bf   : > { %v754_v47 = vmul.f32 0.5, %v752_v46 }
 0x4c1   : > { %v755_v48 = vsub.f32 %v739_v36, %v754_v47 }
 0x4c3   : > { %v756_v49 = vmul.f32 %v755_v48, %v755_v48 }
 0x4c5   : > { %v757_v50 = vsel %vm745_vm4, %v756_v49, 0.0 }
 0x4c6   : > { %v758_v51 = vrot.slane %v757_v50, 4 }
 0x4c8   : > { %v759_v52 = vadd.f32 %v758_v51, %v757_v50 }
 0x4ca   : > { %v760_v53 = vrot.slane %v759_v52, 2 }
 0x4cc   : > { %v761_v54 = vadd.f32 %v760_v53, %v759_v52 }
 0x4ce   : > { %v762_v55 = vrot.slane %v761_v54, 1 }
 0x4d0   : > { %v763_v56 = vadd.f32 %v762_v55, %v761_v54 }
 0x4d2   : > { %v764_v57 = vmul.f32 0.5, %v763_v56 }
 0x4d4   : > { %v765_v58 = vadd.f32 1e-05, %v764_v57 }
 0x4d6   : > { %1459 = vrsqrt.f32 %v765_v58 }
 0x4e0   : > { %v1460_v59 = vpop.eup %1459 }
 0x4e1   : > { %v767_v60 = vmul.f32 %v1460_v59, %v755_v48 }
 0x4e3   : > { %v770_v62 = vpack.c.bf16 %v767_v60, %v767_v60 }
 0x4e5   : > { %1384 = vmatmul.mubr.msk.bf16.vlgmr.msra.gmra.mrb[12].mxu1 %vm290_vm2, %v770_v62  ;;  %1390 = vmatmul.mubr.msk.bf16.vlgmr.msra.gmra.mrb[16].mxu0 %vm290_vm2, %v770_v62 }
 0x4e6   : > { %1400 = vmatpush3.bf16.msra.mxu0 %v1453_v61  ;;  %1401 = vmatprep.mubr.msk.bf16.mxu0 %vm1513_vm0, %v1512_v0 }
 0x4e7   : > { %1395 = vmatprep.mubr.msk.bf16.mxu1 %vm1513_vm0, %v1512_v0  ;;  %1411 = vmatprep.subr.bf16.mxu0 %v1512_v0 }
 0x4e8   : > { %1394 = vmatpush3.bf16.msra.mxu1 %v1454_v63 }
 0x4e9   : > { %1405 = vmatprep.subr.bf16.mxu1 %v1512_v0 }
 0x4ed   : > { %1402 = vmatmul.mubr.msk.bf16.vlgmr.msra.gmra.mrb[20].mxu0 %vm290_vm2, %v770_v62 }
 0x4ee   : > { %1413 = vmatprep.mubr.msk.bf16.mxu0 %vm1513_vm0, %v1512_v0 }
 0x5b8   : > { %v818_v4 = vpop.f32.mrb[12].mxu1  ;;  %v891_v5 = vpop.f32.mrb[16].mxu0 }
 0x5b9   : > { %v819_v6 = vadd.f32 %v818_v4, %v774_v3  ;;  %v1385_v7 = vpop.f32.mrb[13].mxu1  ;;  %v1391_v8 = vpop.f32.mrb[17].mxu0 }
 0x5ba   : > { %v821_v9 = vpop.f32.mrb[14].mxu1  ;;  %v894_v10 = vpop.f32.mrb[18].mxu0 }
 0x5bb   : > { %v824_v11 = vmax.f32 %v819_v6, 0.0  ;;  %v1386_v12 = vpop.f32.mrb[15].mxu1  ;;  %v1392_v13 = vpop.f32.mrb[19].mxu0 }
 0x5bc   : > { %v1075_v12 = vsub.s32 4, %v1620_v19 }
 0x5bd   : > { %v825_v14 = vsel %vm745_vm4, %v824_v11, 0.0 }
 0x5be   : > { %v826_v15 = vrot.slane %v825_v14, 4  ;;  %v1076_v13 = vrot.slane %v1626_v21, %v1075_v12 }
 0x5c0   : > { %v827_v16 = vadd.f32 %v826_v15, %v825_v14  ;;  %v1677_v17 = vpop.f32.mrb[20].mxu0 }
 0x5c1   : > { %v1403_v2 = vpop.f32.mrb[21].mxu0 }
 0x5c2   : > { %v828_v20 = vrot.slane %v827_v16, 2  ;;  %v1021_v22 = vpop.f32.mrb[22].mxu0 }
 0x5c3   : > { %v1404_v23 = vpop.f32.mrb[23].mxu0 }
 0x5c4   : > { %v829_v24 = vadd.f32 %v828_v20, %v827_v16 }
 0x5c6   : > { %v830_v25 = vrot.slane %v829_v24, 1 }
 0x5c8   : > { %v831_v26 = vadd.f32 %v830_v25, %v829_v24  ;;  %v1084_v25 = vsub.s32 5, %v1620_v19 }
 0x5ca   : > { %v832_v27 = vmul.f32 0.5, %v831_v26  ;;  %v1136_v26 = vand.u32 127, %v434_v18 }
 0x5cc   : > { %v833_v28 = vsub.f32 %v824_v11, %v832_v27  ;;  %v1456_v11 = vld [vmem:[#allocation2 + $0x40] sm:$0xff]   ;;  %v1085_v27 = vrot.slane %v1626_v21, %v1084_v25  ;;  %vm1138_vm5 = vcmp.ge.s32.totalorder %v1136_v26, 6  ;;  %vm1139_vm6 = vcmp.lt.s32.totalorder %v1136_v26, 11 }
 0x5cd   : > { %1412 = vmatpush3.bf16.msra.mxu0 %v1456_v11  ;;  %vm1141_vm7 = vcmp.ge.s32.totalorder %v1136_v26, 11  ;;  %vm1142_vm8 = vcmp.lt.s32.totalorder %v1136_v26, 15  ;;  %vm1695_vm9 = vmand %vm1138_vm5, %vm1139_vm6  ;;  %vm1137_vm10 = vcmp.lt.s32.totalorder %v1136_v26, 6 }
 0x5ce   : > { %v834_v29 = vmul.f32 %v833_v28, %v833_v28  ;;  %vm1699_vm12 = vmand %vm1141_vm7, %vm1142_vm8 }
 0x5cf   : > { %vm1144_vm13 = vmor %vm1695_vm9, %vm1699_vm12 }
 0x5d0   : > { %v835_v30 = vsel %vm745_vm4, %v834_v29, 0.0  ;;  %vm1145_vm14 = vmor %vm1137_vm10, %vm1144_vm13 }
 0x5d1   : > { %v836_v31 = vrot.slane %v835_v30, 4 }
 0x5d3   : > { %v837_v32 = vadd.f32 %v836_v31, %v835_v30 }
 0x5d5   : > { %v838_v33 = vrot.slane %v837_v32, 2 }
 0x5d7   : > { %v839_v34 = vadd.f32 %v838_v33, %v837_v32 }
 0x5d9   : > { %v840_v35 = vrot.slane %v839_v34, 1 }
 0x5db   : > { %v841_v36 = vadd.f32 %v840_v35, %v839_v34 }
 0x5dd   : > { %v842_v37 = vmul.f32 0.5, %v841_v36 }
 0x5df   : > { %v843_v38 = vadd.f32 1e-05, %v842_v37 }
 0x5e1   : > { %1461 = vrsqrt.f32 %v843_v38 }
 0x5eb   : > { %v1462_v39 = vpop.eup %1461 }
 0x5ec   : > { %v845_v40 = vmul.f32 %v1462_v39, %v833_v28 }
 0x5ee   : > { %v848_v41 = vpack.c.bf16 %v845_v40, %v845_v40 }
 0x5f0   : > { %1396 = vmatmul.mubr.msk.bf16.vlgmr.msra.gmra.mrb[16].mxu1 %vm290_vm2, %v848_v41 }
 0x5f1   : > { %1407 = vmatprep.mubr.msk.bf16.mxu1 %vm1513_vm0, %v1512_v0  ;;  %1406 = vmatpush3.bf16.msra.mxu1 %v1455_v42 }
 0x6c3   : > { %v940_v45 = vpop.f32.mrb[16].mxu1 }
 0x6c4   : > { %v941_v46 = vadd.f32 %v940_v45, %v891_v5  ;;  %v1397_v47 = vpop.f32.mrb[17].mxu1 }
 0x6c5   : > { %v943_v48 = vpop.f32.mrb[18].mxu1 }
 0x6c6   : > { %v950_v49 = vadd.f32 %v949_v44, %v941_v46  ;;  %v1398_v50 = vpop.f32.mrb[19].mxu1 }
 0x6c8   : > { %v951_v51 = vmax.f32 %v950_v49, 0.0 }
 0x6ca   : > { %v952_v52 = vsel %vm745_vm4, %v951_v51, 0.0 }
 0x6cb   : > { %v953_v53 = vrot.slane %v952_v52, 4 }
 0x6cd   : > { %v954_v54 = vadd.f32 %v953_v53, %v952_v52 }
 0x6cf   : > { %v955_v55 = vrot.slane %v954_v54, 2 }
 0x6d1   : > { %v956_v56 = vadd.f32 %v955_v55, %v954_v54 }
 0x6d3   : > { %v957_v0 = vrot.slane %v956_v56, 1 }
 0x6d5   : > { %v958_v57 = vadd.f32 %v957_v0, %v956_v56 }
 0x6d7   : > { %v959_v58 = vmul.f32 0.5, %v958_v57 }
 0x6d9   : > { %v960_v59 = vsub.f32 %v951_v51, %v959_v58 }
 0x6db   : > { %v961_v60 = vmul.f32 %v960_v59, %v960_v59 }
 0x6dd   : > { %v962_v61 = vsel %vm745_vm4, %v961_v60, 0.0 }
 0x6de   : > { %v963_v62 = vrot.slane %v962_v61, 4 }
 0x6e0   : > { %v964_v63 = vadd.f32 %v963_v62, %v962_v61 }
 0x6e2   : > { %v965_v1 = vrot.slane %v964_v63, 2 }
 0x6e4   : > { %v966_v3 = vadd.f32 %v965_v1, %v964_v63 }
 0x6e6   : > { %v967_v4 = vrot.slane %v966_v3, 1 }
 0x6e8   : > { %v968_v5 = vadd.f32 %v967_v4, %v966_v3 }
 0x6ea   : > { %v969_v6 = vmul.f32 0.5, %v968_v5 }
 0x6ec   : > { %v970_v7 = vadd.f32 1e-05, %v969_v6 }
 0x6ee   : > { %1463 = vrsqrt.f32 %v970_v7 }
 0x6f8   : > { %v1464_v8 = vpop.eup %1463 }
 0x6f9   : > { %v972_v9 = vmul.f32 %v1464_v8, %v960_v59 }
 0x6fb   : > { %v975_v10 = vpack.c.bf16 %v972_v9, %v972_v9 }
 0x6fd   : > { %1408 = vmatmul.mubr.msk.bf16.vlgmr.msra.gmra.mrb[20].mxu1 %vm290_vm2, %v975_v10 }
 0x7d0   : > { %v1067_v14 = vpop.f32.mrb[20].mxu1 }
 0x7d1   : > { %v1068_v15 = vadd.f32 %v1067_v14, %v1677_v17  ;;  %v1409_v16 = vpop.f32.mrb[21].mxu1 }
 0x7d2   : > { %v1070_v2 = vpop.f32.mrb[22].mxu1 }
 0x7d3   : > { %v1077_v20 = vadd.f32 %v1076_v13, %v1068_v15  ;;  %v1410_v22 = vpop.f32.mrb[23].mxu1 }
 0x7d5   : > { %v1078_v23 = vmax.f32 %v1077_v20, 0.0 }
 0x7d7   : > { %v1081_v24 = vpack.c.bf16 %v1078_v23, %v1078_v23 }
 0x7d9   : > { %1414 = vmatmul.mubr.msk.bf16.vlgmr.msra.gmra.mrb[24].mxu0 %vm290_vm2, %v1081_v24 }
 0x8ac   : > { %v1129_v28 = vpop.f32.mrb[24].mxu0 }
 0x8ad   : > { %v1130_v29 = vadd.f32 %v1129_v28, %v1085_v27  ;;  %v1415_v30 = vpop.f32.mrb[25].mxu0 }
 0x8ae   : > { %v1132_v31 = vpop.f32.mrb[26].mxu0 }
 0x8af   : > { %v1416_v18 = vpop.f32.mrb[27].mxu0  ;;  %v1151_v21 = vsel %vm1695_vm9, %v1130_v29, -1e+30  ;;  %v1146_v32 = vsel %vm1137_vm10, %v1130_v29, -1e+30 }
 0x8b0   : > { %v1152_v33 = vsel %vm1147_vm11, %v1151_v21, -inf  ;;  %v1148_v34 = vsel %vm1147_vm11, %v1146_v32, -inf  ;;  %v1155_v35 = vsel %vm1699_vm12, %v1130_v29, -1e+30 }
 0x8b1   : > { %1153 = vmax.xlane.f32.xlu0 %v1152_v33  ;;  %1149 = vmax.xlane.f32.xlu1 %v1148_v34  ;;  %v1156_v36 = vsel %vm1147_vm11, %v1155_v35, -inf }
 0x8b5   : > { %1157 = vmax.xlane.f32.xlu0 %v1156_v36 }
 0x93e   : > { %v1154_v37 = vpop.xlane.xlu0 %1153  ;;  %v1150_v39 = vpop.xlane.xlu1 %1149 }
 0x942   : > { %v1158_v38 = vpop.xlane.xlu0 %1157 }
 0x943   : > { %v1159_v40 = vsel %vm1695_vm9, %v1154_v37, %v1158_v38 }
 0x944   : > { %v1160_v41 = vsel %vm1137_vm10, %v1150_v39, %v1159_v40 }
 0x945   : > { %v1161_v42 = vsub.f32 %v1130_v29, %v1160_v41 }
 0x947   : > { %v1162_v43 = vmul.f32 1.442695, %v1161_v42 }
 0x949   : > { %1465 = vpow2.f32 %v1162_v43 }
 0x953   : > { %v1466_v44 = vpop.eup %1465 }
 0x954   : > { %v1164_v45 = vsel %vm1145_vm14, %v1466_v44, 0.0 }
 0x955   : > { %v1173_v46 = vsel %vm1699_vm12, %v1164_v45, 0.0  ;;  %v1169_v47 = vsel %vm1695_vm9, %v1164_v45, 0.0  ;;  %v1165_v50 = vsel %vm1137_vm10, %v1164_v45, 0.0 }
 0x956   : > { %v1174_v48 = vsel %vm1147_vm11, %v1173_v46, 0.0  ;;  %v1170_v49 = vsel %vm1147_vm11, %v1169_v47, 0.0  ;;  %v1166_v51 = vsel %vm1147_vm11, %v1165_v50, 0.0 }
 0x957   : > { %1175 = vadd.xlane.f32.xlu0 %v1174_v48  ;;  %1171 = vadd.xlane.f32.xlu1 %v1170_v49 }
 0x95b   : > { %1167 = vadd.xlane.f32.xlu1 %v1166_v51 }
 0x9e4   : > { %v1172_v52 = vpop.xlane.xlu1 %1171  ;;  %v1176_v53 = vpop.xlane.xlu0 %1175 }
 0x9e5   : > { %v1177_v54 = vsel %vm1695_vm9, %v1172_v52, %v1176_v53 }
 0x9e8   : > { %v1168_v55 = vpop.xlane.xlu1 %1167 }
 0x9e9   : > { %v1178_v56 = vsel %vm1137_vm10, %v1168_v55, %v1177_v54 }
 0x9ea   : > { %1467 = vrcp.f32 %v1178_v56 }
 0x9f4   : > { %v1468_v0 = vpop.eup %1467 }
 0x9f5   : > { %v1180_v57 = vmul.f32 %v1468_v0, %v1164_v45 }
 0x9f7   : > { %1181 = vst [vmem:[%s271_s28] sm:$0x3] %v1180_v57 }
 0x9f8 PF: > { %s16_s18 = sadd.s32 1, %s1507_s18  }
 0x9f9   : > { %p13_p3 = scmp.ge.s32.totalorder %s16_s18, 6  }
 0x9fb   :  { %15 = sbr.rel (!%p13_p3) target bundleno = 1 (0x1), region = 81 }
 0xa02   :  { %1201 = vsyncpa [#allocation3], 1 }
 0xa03   :  { %1203 = vsyncpa [#allocation3 + $0x1], 1 }

</bundles_post_ra>
